<compile_context>
chip_gen: v6e
topology: v6e:2x2x1
jax: 0.10.0
libtpu: 0.0.40
codegen_flags: <defaults>
</compile_context>

<pallas_src>
import jax
import jax.numpy as jnp
from jax.experimental import pallas as pl
from jax.experimental.pallas import tpu as pltpu


def fc_sv_kernel(x_ref, w1_ref, b1_ref, w2_ref, b2_ref, o_ref):
    # Cast x to bf16 on the VPU just before the MXU (x travels HBM->VMEM as f32).
    x_bf = x_ref[...].astype(jnp.bfloat16)
    # Layer 1: Linear(H -> 128).  bf16 x bf16 -> f32 accumulate on the MXU.
    h = jnp.dot(x_bf, w1_ref[...], preferred_element_type=jnp.float32)
    # Bias + ReLU epilogue in f32 (BN affine already folded into w2/b2).
    h = jnp.maximum(h + b1_ref[...], 0.0)
    # Layer 2: Linear(128 -> D2_pad) with BN folded in; activation to bf16 for MXU.
    out = jnp.dot(h.astype(jnp.bfloat16), w2_ref[...],
                  preferred_element_type=jnp.float32)
    o_ref[...] = (out + b2_ref[...]).astype(o_ref.dtype)


def fc_sv_forward(x, w1, b1, gamma, beta, running_mean, running_var, w2, b2,
                  eps=1e-5, block_b=1024):
    """x: (B, H) float32.  Returns (B, D2) float32.

    BatchNorm1d is applied with inference (eval) semantics: running statistics
    are folded, together with gamma/beta, into the second linear layer.
    """
    B, H = x.shape
    D1 = w1.shape[1]
    D2 = w2.shape[1]

    # ---- Parameter glue (one-time, outside the hot loop, all in f32) ---------
    scale = gamma / jnp.sqrt(running_var + eps)          # (D1,)
    shift = beta - running_mean * scale                  # (D1,)
    w2_eff = scale[:, None] * w2                         # (D1, D2)
    b2_eff = shift @ w2 + b2                             # (D2,)

    # Lane-dense output: pad columns to the next multiple of 128 (weights only).
    D2_pad = ((D2 + 127) // 128) * 128
    if D2_pad != D2:
        w2_eff = jnp.pad(w2_eff, ((0, 0), (0, D2_pad - D2)))
        b2_eff = jnp.pad(b2_eff, (0, D2_pad - D2))

    # bf16 for MXU weight operands; biases stay f32 for the epilogue.
    w1_bf = w1.astype(jnp.bfloat16)
    w2_bf = w2_eff.astype(jnp.bfloat16)
    b1_2d = b1.reshape(1, D1).astype(jnp.float32)
    b2_2d = b2_eff.reshape(1, D2_pad).astype(jnp.float32)

    # ---- Batch tiling ---------------------------------------------------------
    # Big tile (amortize per-step overhead), but aim for >= 2 blocks (v7x's two
    # TensorCores), rounded up to a multiple of 8 (f32 sublanes).  No host-side
    # padding: Pallas masks the ragged last block.
    half = -(-B // 2)                                    # cdiv(B, 2)
    tb = min(block_b, ((half + 7) // 8) * 8)
    tb = max(8, min(tb, ((B + 7) // 8) * 8))
    n_blocks = pl.cdiv(B, tb)

    out = pl.pallas_call(
        fc_sv_kernel,
        out_shape=jax.ShapeDtypeStruct((B, D2_pad), jnp.float32),
        grid=(n_blocks,),
        in_specs=[
            pl.BlockSpec((tb, H), lambda i: (i, 0)),      # x: tiled over batch (f32)
            pl.BlockSpec((H, D1), lambda i: (0, 0)),      # w1: resident (bf16)
            pl.BlockSpec((1, D1), lambda i: (0, 0)),      # b1: resident (f32)
            pl.BlockSpec((D1, D2_pad), lambda i: (0, 0)), # w2 (BN folded): resident (bf16)
            pl.BlockSpec((1, D2_pad), lambda i: (0, 0)),  # b2 (BN folded): resident (f32)
        ],
        out_specs=pl.BlockSpec((tb, D2_pad), lambda i: (i, 0)),
        compiler_params=pltpu.CompilerParams(
            dimension_semantics=("parallel",),            # v7x: shard batch tiles over 2 TCs
            vmem_limit_bytes=48 << 20,                    # > v5e's 16 MiB default, < v7x's 64 MiB
        ),
    )(x.astype(jnp.float32), w1_bf, b1_2d, w2_bf, b2_2d)

    if D2_pad != D2:
        out = out[:, :D2]
    return out


def reference_forward(x, w1, b1, gamma, beta, running_mean, running_var, w2, b2, eps=1e-5):
    """Pure-JAX f32 reference with the original (unfolded) math."""
    h = jnp.maximum(x @ w1 + b1, 0.0)
    h = (h - running_mean) / jnp.sqrt(running_var + eps) * gamma + beta
    return h @ w2 + b2


if __name__ == "__main__":
    # Small, deterministic setup. height = 512 per the module; speakers_num = 128.
    B = 8
    HEIGHT = 512
    D1 = 128         # output_dim
    SPEAKERS = 128   # speakers_num (lane-dense)

    key = jax.random.PRNGKey(0)
    kx, kw1, kb1, kw2, kb2, kg, kbt, kx2 = jax.random.split(key, 8)

    x = jax.random.normal(kx, (B, HEIGHT), dtype=jnp.float32)

    # Deterministic parameter init (uniform, nn.Linear-default-like bounds).
    bound1 = 1.0 / (HEIGHT ** 0.5)
    w1 = jax.random.uniform(kw1, (HEIGHT, D1), jnp.float32, -bound1, bound1)
    b1 = jax.random.uniform(kb1, (D1,), jnp.float32, -bound1, bound1)
    bound2 = 1.0 / (D1 ** 0.5)
    w2 = jax.random.uniform(kw2, (D1, SPEAKERS), jnp.float32, -bound2, bound2)
    b2 = jax.random.uniform(kb2, (SPEAKERS,), jnp.float32, -bound2, bound2)

    # BatchNorm1d params (gamma/beta perturbed; running stats near init values).
    gamma = 1.0 + 0.1 * jax.random.normal(kg, (D1,), dtype=jnp.float32)
    beta = 0.1 * jax.random.normal(kbt, (D1,), dtype=jnp.float32)
    running_mean = jnp.zeros((D1,), dtype=jnp.float32)
    running_var = jnp.ones((D1,), dtype=jnp.float32)

    # bf16 MXU operands => compare against the exact f32 reference with a
    # bf16-appropriate tolerance.
    TOL = dict(atol=2e-2, rtol=2e-2)

    # Run 1: single-block path (small B), speakers already a multiple of 128.
    out = fc_sv_forward(x, w1, b1, gamma, beta, running_mean, running_var, w2, b2)
    out = jax.block_until_ready(out)
    ref = reference_forward(x, w1, b1, gamma, beta, running_mean, running_var, w2, b2)
    assert out.shape == (B, SPEAKERS)
    assert jnp.allclose(out, ref, **TOL), "mismatch vs pure-JAX reference (single block)"

    # Run 2: ragged multi-block batch (B % tb != 0, no host-side pad) and a
    # non-multiple-of-128 speakers count (exercises the column-padding path).
    B2 = 37
    SPK2 = 100
    x2 = jax.random.normal(kx2, (B2, HEIGHT), dtype=jnp.float32)
    w2b = w2[:, :SPK2]
    b2b = b2[:SPK2]
    out2 = fc_sv_forward(x2, w1, b1, gamma, beta, running_mean, running_var, w2b, b2b)
    out2 = jax.block_until_ready(out2)
    ref2 = reference_forward(x2, w1, b1, gamma, beta, running_mean, running_var, w2b, b2b)
    assert out2.shape == (B2, SPK2)
    assert jnp.allclose(out2, ref2, **TOL), "mismatch vs pure-JAX reference (ragged tiled batch)"

    print("KERNEL_OK")
</pallas_src>

<mosaic_0001>
module attributes {stable_mosaic.version = 11 : i64} {
  func.func @fc_sv_kernel(%arg0: i32, %arg1: memref<8x512xf32, #tpu.memory_space<vmem>>, %arg2: memref<512x128xbf16, #tpu.memory_space<vmem>>, %arg3: memref<1x128xf32, #tpu.memory_space<vmem>>, %arg4: memref<128x128xbf16, #tpu.memory_space<vmem>>, %arg5: memref<1x128xf32, #tpu.memory_space<vmem>>, %arg6: memref<8x128xf32, #tpu.memory_space<vmem>>) attributes {dimension_semantics = [#tpu.dimension_semantics<parallel>], iteration_bounds = array<i64: 1>, scalar_prefetch = 0 : i64, scratch_operands = 0 : i64, tpu.core_type = #tpu.core_type<tc>, window_params = [{transform_indices = @transform_0, window_bounds = array<i64: 8, 512>}, {pipeline_mode = #tpu.pipeline_mode<synchronous>, transform_indices = @transform_1, window_bounds = array<i64: 512, 128>}, {pipeline_mode = #tpu.pipeline_mode<synchronous>, transform_indices = @transform_2, window_bounds = array<i64: 1, 128>}, {pipeline_mode = #tpu.pipeline_mode<synchronous>, transform_indices = @transform_3, window_bounds = array<i64: 128, 128>}, {pipeline_mode = #tpu.pipeline_mode<synchronous>, transform_indices = @transform_4, window_bounds = array<i64: 1, 128>}, {transform_indices = @transform_5, window_bounds = array<i64: 8, 128>}]} {
    %c0 = arith.constant 0 : index
    %c0_0 = arith.constant 0 : index
    %0 = vector.load %arg1[%c0, %c0_0] : memref<8x512xf32, #tpu.memory_space<vmem>>, vector<8x512xf32>
    %1 = arith.truncf %0 : vector<8x512xf32> to vector<8x512xbf16>
    %c0_1 = arith.constant 0 : index
    %c0_2 = arith.constant 0 : index
    %2 = vector.load %arg2[%c0_1, %c0_2] : memref<512x128xbf16, #tpu.memory_space<vmem>>, vector<512x128xbf16>
    %cst = arith.constant dense<0.000000e+00> : vector<8x128xf32>
    %3 = tpu.matmul %1, %2, %cst {dimension_numbers = #tpu.dot_dimension_numbers<[1], [0], [0], [1], [0, 0, 1, 1], [], []>} : vector<8x512xbf16>, vector<512x128xbf16>, vector<8x128xf32> -> vector<8x128xf32>
    %c0_3 = arith.constant 0 : index
    %c0_4 = arith.constant 0 : index
    %4 = vector.load %arg3[%c0_3, %c0_4] : memref<1x128xf32, #tpu.memory_space<vmem>>, vector<1x128xf32>
    %5 = vector.broadcast %4 : vector<1x128xf32> to vector<8x128xf32>
    %6 = arith.addf %3, %5 : vector<8x128xf32>
    %cst_5 = arith.constant 0.000000e+00 : f32
    %7 = vector.broadcast %cst_5 : f32 to vector<8x128xf32>
    %8 = arith.maximumf %6, %7 : vector<8x128xf32>
    %9 = arith.truncf %8 : vector<8x128xf32> to vector<8x128xbf16>
    %c0_6 = arith.constant 0 : index
    %c0_7 = arith.constant 0 : index
    %10 = vector.load %arg4[%c0_6, %c0_7] : memref<128x128xbf16, #tpu.memory_space<vmem>>, vector<128x128xbf16>
    %cst_8 = arith.constant dense<0.000000e+00> : vector<8x128xf32>
    %11 = tpu.matmul %9, %10, %cst_8 {dimension_numbers = #tpu.dot_dimension_numbers<[1], [0], [0], [1], [0, 0, 1, 1], [], []>} : vector<8x128xbf16>, vector<128x128xbf16>, vector<8x128xf32> -> vector<8x128xf32>
    %c0_9 = arith.constant 0 : index
    %c0_10 = arith.constant 0 : index
    %12 = vector.load %arg5[%c0_9, %c0_10] : memref<1x128xf32, #tpu.memory_space<vmem>>, vector<1x128xf32>
    %13 = vector.broadcast %12 : vector<1x128xf32> to vector<8x128xf32>
    %14 = arith.addf %11, %13 : vector<8x128xf32>
    %c0_11 = arith.constant 0 : index
    %c0_12 = arith.constant 0 : index
    %15 = vector.load %arg6[%c0_11, %c0_12] : memref<8x128xf32, #tpu.memory_space<vmem>>, vector<8x128xf32>
    tpu.vector_store %arg6[%c0_11, %c0_12], %14 {strides = array<i32>} : memref<8x128xf32, #tpu.memory_space<vmem>>, vector<8x128xf32>,
    return
  }
  func.func @transform_0(%arg0: i32) -> (i32, i32) {
    %c0_i32 = arith.constant 0 : i32
    %c0_i32_0 = arith.constant 0 : i32
    return %arg0, %c0_i32 : i32, i32
  }
  func.func @transform_1(%arg0: i32) -> (i32, i32) {
    %c0_i32 = arith.constant 0 : i32
    %c0_i32_0 = arith.constant 0 : i32
    %c0_i32_1 = arith.constant 0 : i32
    return %c0_i32, %c0_i32_0 : i32, i32
  }
  func.func @transform_2(%arg0: i32) -> (i32, i32) {
    %c0_i32 = arith.constant 0 : i32
    %c0_i32_0 = arith.constant 0 : i32
    %c0_i32_1 = arith.constant 0 : i32
    return %c0_i32, %c0_i32_0 : i32, i32
  }
  func.func @transform_3(%arg0: i32) -> (i32, i32) {
    %c0_i32 = arith.constant 0 : i32
    %c0_i32_0 = arith.constant 0 : i32
    %c0_i32_1 = arith.constant 0 : i32
    return %c0_i32, %c0_i32_0 : i32, i32
  }
  func.func @transform_4(%arg0: i32) -> (i32, i32) {
    %c0_i32 = arith.constant 0 : i32
    %c0_i32_0 = arith.constant 0 : i32
    %c0_i32_1 = arith.constant 0 : i32
    return %c0_i32, %c0_i32_0 : i32, i32
  }
  func.func @transform_5(%arg0: i32) -> (i32, i32) {
    %c0_i32 = arith.constant 0 : i32
    %c0_i32_0 = arith.constant 0 : i32
    return %arg0, %c0_i32 : i32, i32
  }
}

</mosaic_0001>

<bundles_post_ra>
// kernel: tpu_custom_call.1
= control target key start
LH: loop header
LB: loop body
LE: loop exit
PB: predicated region body
PF: predicated region fallthrough
CT: control target
= control target key end

     0   :  { %10 = vsyncpa [#allocation3], 0  ;;  %s847_s0 = inlined_call_operand.hbm [shape: f32[8,512], index: 0, kind: input, shape index: {}]   ;;  %s848_s1 = inlined_call_operand.hbm [shape: bf16[512,128], index: 1, kind: input, shape index: {}]   ;;  %s849_s2 = inlined_call_operand.vmem [shape: f32[1,128], index: 2, kind: input, shape index: {}]   ;;  %s850_s3 = inlined_call_operand.hbm [shape: bf16[128,128], index: 3, kind: input, shape index: {}]   ;;  %s851_s4 = inlined_call_operand.vmem [shape: f32[1,128], index: 4, kind: input, shape index: {}]   ;;  %s852_s5 = inlined_call_operand.hbm [shape: f32[8,128], index: 5, kind: output, shape index: {}]  }
   0x1   :  { %11 = vsyncpa [#allocation6], 0 }
   0x2   :  { %12 = vsyncpa [#allocation4], 0  ;;  %s791_s18 = smov [#allocation5]  }
   0x3   :  { %s28_s19 = sshll.u32 %s791_s18, 4  ;;  %s29_s19 = int_to_ptr.vmem [resolvable:$true] %s28_s19 }
   0x4   :  { %s713_s20 = scalar_lea.vmem %s29_s19, 4096  ;;  %p718_p1 = scmp.lt.s32.totalorder %s29_s19, %s29_s19 }
   0x5   :  { %p714_p0 = scmp.ne.s32.totalorder %s29_s19, %s713_s20  ;;  %p719_p2 = scmp.lt.s32.totalorder %s713_s20, %s713_s20 }
   0x7   :  { %p720_p3 = por %p719_p2, %p718_p1 }
   0x9   :  { %p721_p4 = pnand %p720_p3, %p714_p0 }
   0xb   :  { %724 = shalt.err (!%p721_p4)
}
   0xc   :  { %s792_s21 = smov 64   ;;  %s793_s22 = smov 4  }
   0xd   :  { %34 = dma.hbm_to_vmem [thread:$0]  %s848_s1, 4096, %s29_s19, [#allocation6], %s792_s21, %s792_s21, %s793_s22  }
   0xe   :  { %s794_s25 = smov [#allocation2]   ;;  %s795_s27 = smov [#allocation7]  }
   0xf   :  { %s19_s26 = sshll.u32 %s794_s25, 4  ;;  %s42_s28 = sshll.u32 %s795_s27, 4  ;;  %s20_s26 = int_to_ptr.vmem [resolvable:$true] %s19_s26  ;;  %s43_s28 = int_to_ptr.vmem [resolvable:$true] %s42_s28 }
  0x10   :  { %s733_s29 = scalar_lea.vmem %s20_s26, 512  ;;  %p738_p6 = scmp.lt.s32.totalorder %s20_s26, %s20_s26 }
  0x11   :  { %p734_p5 = scmp.ne.s32.totalorder %s20_s26, %s733_s29  ;;  %p739_p7 = scmp.lt.s32.totalorder %s733_s29, %s733_s29 }
  0x13   :  { %p740_p8 = por %p739_p7, %p738_p6 }
  0x15   :  { %p741_p9 = pnand %p740_p8, %p734_p5 }
  0x17   :  { %744 = shalt.err (!%p741_p9)
}
  0x18   :  { %22 = dma.hbm_to_vmem [thread:$0]  %s847_s0, 512, %s20_s26, [#allocation3]  }
  0x19   :  { %s753_s7 = scalar_lea.vmem %s43_s28, 1024  ;;  %p758_p11 = scmp.lt.s32.totalorder %s43_s28, %s43_s28 }
  0x1a   :  { %p754_p10 = scmp.ne.s32.totalorder %s43_s28, %s753_s7  ;;  %p759_p12 = scmp.lt.s32.totalorder %s753_s7, %s753_s7 }
  0x1c   :  { %p760_p13 = por %p759_p12, %p758_p11 }
  0x1e   :  { %p761_p0 = pnand %p760_p13, %p754_p10 }
  0x20   :  { %764 = shalt.err (!%p761_p0)
}
  0x21   :  { %48 = dma.hbm_to_vmem [thread:$0]  %s850_s3, 1024, %s43_s28, [#allocation6], %s792_s21, %s792_s21, %s793_s22  }
  0x22   :  { %785 = dma.done.wait [#allocation3], 512  }
  0x23   :  { %786 = vsyncadd [#allocation3], 4294966784 }
  0x24   :  { %787 = dma.done.wait [#allocation6], 5120  }
  0x25   :  { %788 = vsyncadd [#allocation6], 4294962176  ;;  %v665_v0 = vld [vmem:[#allocation5 + $0x78] sm:$0xff]   ;;  %v669_v4 = vld [vmem:[#allocation5 + $0x70] sm:$0xff]   ;;  %v796_v39 = vmov 0.0   ;;  %vm797_vm0 = vmmov 0  }
  0x26   :  { %v666_v1 = vld [vmem:[#allocation5 + $0xf8] sm:$0xff]   ;;  %584 = vmatprep.subr.bf16.mxu0 %v665_v0  ;;  %v670_v5 = vld [vmem:[#allocation5 + $0xf0] sm:$0xff]   ;;  %v673_v8 = vld [vmem:[#allocation5 + $0x68] sm:$0xff]   ;;  %s798_s11 = smov [#allocation8]  }
  0x27   :  { %v667_v2 = vld [vmem:[#allocation5 + $0x38] sm:$0xff]   ;;  %606 = vmatprep.subr.bf16.mxu1 %v666_v1  ;;  %v671_v6 = vld [vmem:[#allocation5 + $0x30] sm:$0xff]   ;;  %v674_v9 = vld [vmem:[#allocation5 + $0xe8] sm:$0xff]   ;;  %s532_s12 = sshll.u32 %s798_s11, 4  ;;  %s533_s12 = int_to_ptr.vmem [resolvable:$true] %s532_s12 }
  0x28   :  { %v668_v3 = vld [vmem:[#allocation5 + $0xb8] sm:$0xff]   ;;  %585 = vmatpush3.bf16.msra.mxu0 %v667_v2  ;;  %v672_v7 = vld [vmem:[#allocation5 + $0xb0] sm:$0xff]   ;;  %v675_v10 = vld [vmem:[#allocation5 + $0x28] sm:$0xff]   ;;  %p770_p2 = scmp.lt.s32.totalorder %s533_s12, %s533_s12 }
  0x29   :  { %607 = vmatpush3.bf16.msra.mxu1 %v668_v3  ;;  %586 = vmatprep.subr.bf16.mxu0 %v669_v4  ;;  %v676_v11 = vld [vmem:[#allocation5 + $0xa8] sm:$0xff]   ;;  %v677_v12 = vld [vmem:[#allocation5 + $0x60] sm:$0xff]   ;;  %v681_v16 = vld [vmem:[#allocation5 + $0x58] sm:$0xff]  }
  0x2a   :  { %608 = vmatprep.subr.bf16.mxu1 %v670_v5  ;;  %v678_v13 = vld [vmem:[#allocation5 + $0xe0] sm:$0xff]   ;;  %v682_v17 = vld [vmem:[#allocation5 + $0xd8] sm:$0xff]   ;;  %v685_v20 = vld [vmem:[#allocation5 + $0x50] sm:$0xff]  }
  0x2b   :  { %v679_v14 = vld [vmem:[#allocation5 + $0x20] sm:$0xff]   ;;  %v683_v18 = vld [vmem:[#allocation5 + $0x18] sm:$0xff]   ;;  %v686_v21 = vld [vmem:[#allocation5 + $0xd0] sm:$0xff]  }
  0x2c   :  { %587 = vmatpush3.bf16.msra.mxu0 %v671_v6  ;;  %v680_v15 = vld [vmem:[#allocation5 + $0xa0] sm:$0xff]   ;;  %v684_v19 = vld [vmem:[#allocation5 + $0x98] sm:$0xff]   ;;  %v687_v22 = vld [vmem:[#allocation5 + $0x10] sm:$0xff]  }
  0x2d   :  { %609 = vmatpush3.bf16.msra.mxu1 %v672_v7  ;;  %588 = vmatprep.subr.bf16.mxu0 %v673_v8  ;;  %v688_v23 = vld [vmem:[#allocation5 + $0x90] sm:$0xff]   ;;  %v689_v24 = vld [vmem:[#allocation5 + $0x48] sm:$0xff]   ;;  %v693_v28 = vld [vmem:[#allocation5 + $0x40] sm:$0xff]  }
  0x2e   :  { %610 = vmatprep.subr.bf16.mxu1 %v674_v9  ;;  %v690_v25 = vld [vmem:[#allocation5 + $0xc8] sm:$0xff]   ;;  %v694_v29 = vld [vmem:[#allocation5 + $0xc0] sm:$0xff]   ;;  %v64_v33 = vld [vmem:[#allocation2 + $0x18] sm:$0xff] }
  0x2f   :  { %v691_v26 = vld [vmem:[#allocation5 + $0x8] sm:$0xff]   ;;  %v695_v30 = vld [vmem:[#allocation5] sm:$0xff]   ;;  %v68_v36 = vpack.c.bf16 %v64_v33, %v64_v33  ;;  %v63_v38 = vld [vmem:[#allocation2 + $0x10] sm:$0xff] }
  0x30   :  { %589 = vmatpush3.bf16.msra.mxu0 %v675_v10  ;;  %v692_v27 = vld [vmem:[#allocation5 + $0x88] sm:$0xff]   ;;  %v696_v31 = vld [vmem:[#allocation5 + $0x80] sm:$0xff]   ;;  %v67_v40 = vpack.c.bf16 %v63_v38, %v63_v38  ;;  %v697_v41 = vld [vmem:[#allocation7 + $0x38] sm:$0xff]  }
  0x31   :  { %611 = vmatpush3.bf16.msra.mxu1 %v676_v11  ;;  %590 = vmatprep.subr.bf16.mxu0 %v677_v12  ;;  %v62_v32 = vld [vmem:[#allocation2 + $0x8] sm:$0xff]  ;;  %v61_v34 = vld [vmem:[#allocation2] sm:$0xff]  ;;  %v698_v42 = vld [vmem:[#allocation7 + $0x30] sm:$0xff]  }
  0x32   :  { %612 = vmatprep.subr.bf16.mxu1 %v678_v13  ;;  %v66_v35 = vpack.c.bf16 %v62_v32, %v62_v32  ;;  %v65_v37 = vpack.c.bf16 %v61_v34, %v61_v34  ;;  %404 = vmatprep.mubr.bf16.mxu1 %v68_v36  ;;  %v699_v43 = vld [vmem:[#allocation7 + $0x28] sm:$0xff]   ;;  %v700_v44 = vld [vmem:[#allocation7 + $0x20] sm:$0xff]   ;;  %v701_v45 = vld [vmem:[#allocation7 + $0x18] sm:$0xff]  }
  0x33   :  { %v702_v46 = vld [vmem:[#allocation7 + $0x10] sm:$0xff]   ;;  %v703_v47 = vld [vmem:[#allocation7 + $0x8] sm:$0xff]   ;;  %v704_v48 = vld [vmem:[#allocation7] sm:$0xff]  }
  0x34   :  { %591 = vmatpush3.bf16.msra.mxu0 %v679_v14  ;;  %364 = vmatprep.mubr.bf16.mxu0 %v66_v35  ;;  %v542_v51 = vld [vmem:[%s849_s2] ss:$0 sm:$0xff]  ;;  %s765_s2 = scalar_lea.vmem %s533_s12, 128 }
  0x35   :  { %613 = vmatpush3.bf16.msra.mxu1 %v680_v15  ;;  %592 = vmatprep.subr.bf16.mxu0 %v681_v16  ;;  %v575_v0 = vld [vmem:[%s851_s4] ss:$0 sm:$0xff]  ;;  %p766_p1 = scmp.ne.s32.totalorder %s533_s12, %s765_s2  ;;  %p771_p3 = scmp.lt.s32.totalorder %s765_s2, %s765_s2 }
  0x36   :  { %614 = vmatprep.subr.bf16.mxu1 %v682_v17 }
  0x37   :  { %p772_p4 = por %p771_p3, %p770_p2 }
  0x38   :  { %593 = vmatpush3.bf16.msra.mxu0 %v683_v18 }
  0x39   :  { %615 = vmatpush3.bf16.msra.mxu1 %v684_v19  ;;  %594 = vmatprep.subr.bf16.mxu0 %v685_v20  ;;  %p773_p5 = pnand %p772_p4, %p766_p1 }
  0x3a   :  { %616 = vmatprep.subr.bf16.mxu1 %v686_v21 }
  0x3c   :  { %595 = vmatpush3.bf16.msra.mxu0 %v687_v22 }
  0x3d   :  { %617 = vmatpush3.bf16.msra.mxu1 %v688_v23  ;;  %596 = vmatprep.subr.bf16.mxu0 %v689_v24 }
  0x3e   :  { %618 = vmatprep.subr.bf16.mxu1 %v690_v25 }
  0x40   :  { %597 = vmatpush3.bf16.msra.mxu0 %v691_v26 }
  0x41   :  { %619 = vmatpush3.bf16.msra.mxu1 %v692_v27  ;;  %598 = vmatprep.subr.bf16.mxu0 %v693_v28 }
  0x42   :  { %620 = vmatprep.subr.bf16.mxu1 %v694_v29 }
  0x44   :  { %599 = vmatpush3.bf16.msra.mxu0 %v695_v30 }
  0x45   :  { %621 = vmatpush3.bf16.msra.mxu1 %v696_v31  ;;  %637 = vmatprep.subr.bf16.mxu0 %v796_v39 }
  0x47   :  { %365 = vmatmul.mubr.bf16.vlgmr.msra.gmra.mxu0 %v65_v37 }
  0x48   :  { %405 = vmatmul.mubr.bf16.vlgmr.msra.gmra.mxu1 %v67_v40  ;;  %638 = vmatpush3.bf16.msra.mxu0 %v697_v41 }
  0x49   :  { %639 = vmatprep.subr.bf16.mxu0 %v796_v39  ;;  %653 = vmatprep.mubr.msk.bf16.mxu0 %vm797_vm0, %v796_v39 }
  0x4c   :  { %640 = vmatpush3.bf16.msra.mxu0 %v698_v42 }
  0x4d   :  { %641 = vmatprep.subr.bf16.mxu0 %v796_v39 }
  0x50   :  { %642 = vmatpush3.bf16.msra.mxu0 %v699_v43 }
  0x51   :  { %643 = vmatprep.subr.bf16.mxu0 %v796_v39 }
  0x54   :  { %644 = vmatpush3.bf16.msra.mxu0 %v700_v44 }
  0x55   :  { %645 = vmatprep.subr.bf16.mxu0 %v796_v39 }
  0x58   :  { %646 = vmatpush3.bf16.msra.mxu0 %v701_v45 }
  0x59   :  { %647 = vmatprep.subr.bf16.mxu0 %v796_v39 }
  0x5c   :  { %648 = vmatpush3.bf16.msra.mxu0 %v702_v46 }
  0x5d   :  { %649 = vmatprep.subr.bf16.mxu0 %v796_v39 }
  0x60   :  { %650 = vmatpush3.bf16.msra.mxu0 %v703_v47 }
  0x61   :  { %651 = vmatprep.subr.bf16.mxu0 %v796_v39 }
  0x64   :  { %652 = vmatpush3.bf16.msra.mxu0 %v704_v48 }
 0x107   :  { %v600_v49 = vpop.f32.mrf.mxu0 }
 0x108   :  { %v622_v50 = vpop.f32.mrf.mxu1 }
 0x109   :  { %v601_v52 = vpop.f32.mrf.mxu0 }
 0x10a   :  { %v623_v53 = vpop.f32.mrf.mxu1  ;;  %v602_v54 = vadd.f32 %v601_v52, %v600_v49 }
 0x10b   :  { %v603_v55 = vpop.f32.mrf.mxu0  ;;  %v624_v58 = vadd.f32 %v623_v53, %v622_v50 }
 0x10c   :  { %v625_v56 = vpop.f32.mrf.mxu1  ;;  %v367_v57 = vadd.f32 %v602_v54, %v542_v51 }
 0x10d   :  { %v604_v59 = vpop.f32.mrf.mxu0 }
 0x10e   :  { %v626_v60 = vpop.f32.mrf.mxu1  ;;  %v407_v61 = vadd.f32 %v624_v58, %v367_v57 }
 0x110   :  { %v412_v62 = vmax.f32 %v407_v61, 0.0 }
 0x112   :  { %v413_v63 = vpack.c.bf16 %v412_v62, %v412_v62 }
 0x114   :  { %654 = vmatmul.mubr.bf16.vlgmr.msra.gmra.mxu0 %v413_v63 }
 0x1d4   :  { %v519_v1 = vpop.f32.mrf.mxu0 }
 0x1d5   :  { %v520_v2 = vadd.f32 %v575_v0, %v519_v1 }
 0x1d6   :  { %v655_v3 = vpop.f32.mrf.mxu0 }
 0x1d7   :  { %525 = vst [vmem:[#allocation8] sm:$0xff] %v520_v2 }
 0x1d8   :  { %v522_v4 = vpop.f32.mrf.mxu0 }
 0x1d9   :  { %776 = shalt.err (!%p773_p5)
}
 0x1da   :  { %535 = dma.vmem_to_hbm [thread:$0]  %s533_s12, 128, %s852_s5, [#allocation4]   ;;  %v656_v5 = vpop.f32.mrf.mxu0 }
 0x1db   :  { %789 = dma.done.wait [#allocation4], 128  }
 0x1dc   :  { %790 = vsyncadd [#allocation4], 4294967168 }
 0x1dd   :  { %539 = vsyncpa [#allocation3], 1 }
 0x1de   :  { %540 = vsyncpa [#allocation6], 1 }
 0x1df   :  { %541 = vsyncpa [#allocation4], 1 }

</bundles_post_ra>
